<compile_context>
chip_gen: v7x
topology: tpu7x:2x2x1
jax: 0.10.0
libtpu: 0.0.40
codegen_flags: <defaults>
</compile_context>

<pallas_src>
import jax
import jax.numpy as jnp
from jax.experimental import pallas as pl
from jax.experimental.pallas import tpu as pltpu

N_IN = 1024
H1 = 256
H2 = 64
H2_PAD = 128       # fc2 output padded to full lane width
N_CLASSES = 19
N_OUT_PAD = 128    # classifier padded to lane-dense 128


def _round_up(n, m):
    return ((n + m - 1) // m) * m


def mlp_kernel(x_ref, w1_ref, b1_ref, w2_ref, b2_ref, w3_ref, b3_ref, o_ref):
    # fc1 + ReLU  (bf16 operands, f32 accumulation on the MXU)
    h1 = jnp.dot(x_ref[...], w1_ref[...], preferred_element_type=jnp.float32)
    h1 = jnp.maximum(h1 + b1_ref[...], 0.0).astype(jnp.bfloat16)

    # fc2 (padded to 128 cols; padded cols are exactly 0 after ReLU) + ReLU
    h2 = jnp.dot(h1, w2_ref[...], preferred_element_type=jnp.float32)
    h2 = jnp.maximum(h2 + b2_ref[...], 0.0).astype(jnp.bfloat16)

    # fc3 (padded to 128 cols; padded cols carry a -1e30 bias)
    logits = jnp.dot(h2, w3_ref[...], preferred_element_type=jnp.float32) + b3_ref[...]

    # Numerically stable softmax over the class lanes.  Padded lanes have
    # logit ~ -1e30 -> exp underflows to exactly 0, so the row sum only
    # covers the 19 real classes.
    m = jnp.max(logits, axis=1, keepdims=True)
    e = jnp.exp(logits - m)
    denom = jnp.sum(e, axis=1, keepdims=True)
    o_ref[...] = (e * pl.reciprocal(denom, approx=True)).astype(o_ref.dtype)


def mlp_forward(x, params, *, block_b=1024):
    """x: (B, 1024) float32 -> (B, 19) float32 softmax probabilities."""
    w1, b1, w2, b2, w3, b3 = params
    B = x.shape[0]

    # --- batch padding / tile selection ---------------------------------
    B_pad = _round_up(max(B, 16), 16)        # >= bf16 sublane packing
    TB = min(block_b, B_pad)
    B_pad = _round_up(B_pad, TB)             # grid divides evenly
    if B_pad != B:
        x = jnp.pad(x, ((0, B_pad - B), (0, 0)))
    nb = B_pad // TB

    # --- cast / pad parameters once at the boundary ---------------------
    x_bf = x.astype(jnp.bfloat16)
    w1_bf = w1.astype(jnp.bfloat16)
    b1_f = b1.astype(jnp.float32).reshape(1, H1)

    w2_p = jnp.zeros((H1, H2_PAD), jnp.bfloat16).at[:, :H2].set(w2.astype(jnp.bfloat16))
    b2_p = jnp.zeros((1, H2_PAD), jnp.float32).at[:, :H2].set(
        b2.astype(jnp.float32).reshape(1, H2))

    w3_p = jnp.zeros((H2_PAD, N_OUT_PAD), jnp.bfloat16).at[:H2, :N_CLASSES].set(
        w3.astype(jnp.bfloat16))
    b3_p = jnp.full((1, N_OUT_PAD), -1e30, jnp.float32).at[:, :N_CLASSES].set(
        b3.astype(jnp.float32).reshape(1, N_CLASSES))

    # --- cost hint for the XLA scheduler ---------------------------------
    flops = 2 * B_pad * (N_IN * H1 + H1 * H2_PAD + H2_PAD * N_OUT_PAD)
    transcendentals = B_pad * (N_OUT_PAD + 1)          # exp lanes + reciprocal
    weight_bytes = (w1_bf.size * 2 + b1_f.size * 4 + w2_p.size * 2
                    + b2_p.size * 4 + w3_p.size * 2 + b3_p.size * 4)
    bytes_accessed = B_pad * N_IN * 2 + weight_bytes + B_pad * N_OUT_PAD * 4

    out = pl.pallas_call(
        mlp_kernel,
        out_shape=jax.ShapeDtypeStruct((B_pad, N_OUT_PAD), jnp.float32),
        grid=(nb,),
        in_specs=[
            pl.BlockSpec((TB, N_IN), lambda i: (i, 0)),        # x: streamed per tile
            pl.BlockSpec((N_IN, H1), lambda i: (0, 0)),        # weights: VMEM-resident
            pl.BlockSpec((1, H1), lambda i: (0, 0)),
            pl.BlockSpec((H1, H2_PAD), lambda i: (0, 0)),
            pl.BlockSpec((1, H2_PAD), lambda i: (0, 0)),
            pl.BlockSpec((H2_PAD, N_OUT_PAD), lambda i: (0, 0)),
            pl.BlockSpec((1, N_OUT_PAD), lambda i: (0, 0)),
        ],
        out_specs=pl.BlockSpec((TB, N_OUT_PAD), lambda i: (i, 0)),
        compiler_params=pltpu.CompilerParams(
            dimension_semantics=("parallel",),   # megacore sharding on v7x
            vmem_limit_bytes=48 << 20,
        ),
        cost_estimate=pl.CostEstimate(
            flops=flops,
            transcendentals=transcendentals,
            bytes_accessed=bytes_accessed,
        ),
    )(x_bf, w1_bf, b1_f, w2_p, b2_p, w3_p, b3_p)

    return out[:B, :N_CLASSES]


def init_params(key):
    """Deterministic init matching torch.nn.Linear shapes (weights transposed)."""
    dims = [(N_IN, H1), (H1, H2), (H2, N_CLASSES)]
    params = []
    for d_in, d_out in dims:
        kw, kb, key = jax.random.split(key, 3)
        bound = 1.0 / jnp.sqrt(d_in)
        w = jax.random.uniform(kw, (d_in, d_out), jnp.float32, -bound, bound)
        b = jax.random.uniform(kb, (1, d_out), jnp.float32, -bound, bound)
        params += [w, b]
    return tuple(params)


def reference_forward_f32(x, params):
    """Pure f32 reference (matches the PyTorch module semantics)."""
    w1, b1, w2, b2, w3, b3 = params
    h1 = jnp.maximum(x @ w1 + b1, 0.0)
    h2 = jnp.maximum(h1 @ w2 + b2, 0.0)
    return jax.nn.softmax(h2 @ w3 + b3, axis=1)


def reference_forward_matched(x, params):
    """Reference that replicates the kernel's bf16 casts (tight comparison)."""
    w1, b1, w2, b2, w3, b3 = params
    r = lambda a: a.astype(jnp.bfloat16).astype(jnp.float32)
    h1 = r(jnp.maximum(r(x) @ r(w1) + b1, 0.0))
    h2 = r(jnp.maximum(h1 @ r(w2) + b2, 0.0))
    return jax.nn.softmax(h2 @ r(w3) + b3, axis=1)


if __name__ == "__main__":
    key = jax.random.PRNGKey(0)
    kx, kp = jax.random.split(key)

    B = 2
    x = jax.random.normal(kx, (B, N_IN), jnp.float32)
    params = init_params(kp)

    out = jax.block_until_ready(mlp_forward(x, params))
    ref_matched = reference_forward_matched(x, params)
    ref_f32 = reference_forward_f32(x, params)

    assert out.shape == (B, N_CLASSES), out.shape
    assert jnp.allclose(out, ref_matched, atol=2e-3, rtol=2e-3), "mismatch vs bf16-matched ref"
    assert jnp.allclose(out, ref_f32, atol=2e-2), "mismatch vs f32 reference"
    assert jnp.allclose(jnp.sum(out, axis=1), 1.0, atol=5e-3), "softmax rows must sum to 1"

    print("KERNEL_OK")
</pallas_src>

<mosaic_0001>
module attributes {stable_mosaic.version = 11 : i64} {
  func.func @mlp_kernel(%arg0: i32, %arg1: memref<16x1024xbf16, #tpu.memory_space<vmem>>, %arg2: memref<1024x256xbf16, #tpu.memory_space<vmem>>, %arg3: memref<1x256xf32, #tpu.memory_space<vmem>>, %arg4: memref<256x128xbf16, #tpu.memory_space<vmem>>, %arg5: memref<1x128xf32, #tpu.memory_space<vmem>>, %arg6: memref<128x128xbf16, #tpu.memory_space<vmem>>, %arg7: memref<1x128xf32, #tpu.memory_space<vmem>>, %arg8: memref<16x128xf32, #tpu.memory_space<vmem>>) attributes {dimension_semantics = [#tpu.dimension_semantics<parallel>], iteration_bounds = array<i64: 1>, scalar_prefetch = 0 : i64, scratch_operands = 0 : i64, tpu.core_type = #tpu.core_type<tc>, window_params = [{transform_indices = @transform_0, window_bounds = array<i64: 16, 1024>}, {pipeline_mode = #tpu.pipeline_mode<synchronous>, transform_indices = @transform_1, window_bounds = array<i64: 1024, 256>}, {pipeline_mode = #tpu.pipeline_mode<synchronous>, transform_indices = @transform_2, window_bounds = array<i64: 1, 256>}, {pipeline_mode = #tpu.pipeline_mode<synchronous>, transform_indices = @transform_3, window_bounds = array<i64: 256, 128>}, {pipeline_mode = #tpu.pipeline_mode<synchronous>, transform_indices = @transform_4, window_bounds = array<i64: 1, 128>}, {pipeline_mode = #tpu.pipeline_mode<synchronous>, transform_indices = @transform_5, window_bounds = array<i64: 128, 128>}, {pipeline_mode = #tpu.pipeline_mode<synchronous>, transform_indices = @transform_6, window_bounds = array<i64: 1, 128>}, {transform_indices = @transform_7, window_bounds = array<i64: 16, 128>}]} {
    %c0 = arith.constant 0 : index
    %c0_0 = arith.constant 0 : index
    %0 = vector.load %arg1[%c0, %c0_0] : memref<16x1024xbf16, #tpu.memory_space<vmem>>, vector<16x1024xbf16>
    %c0_1 = arith.constant 0 : index
    %c0_2 = arith.constant 0 : index
    %1 = vector.load %arg2[%c0_1, %c0_2] : memref<1024x256xbf16, #tpu.memory_space<vmem>>, vector<1024x256xbf16>
    %cst = arith.constant dense<0.000000e+00> : vector<16x256xf32>
    %2 = tpu.matmul %0, %1, %cst {dimension_numbers = #tpu.dot_dimension_numbers<[1], [0], [0], [1], [0, 0, 1, 1], [], []>} : vector<16x1024xbf16>, vector<1024x256xbf16>, vector<16x256xf32> -> vector<16x256xf32>
    %c0_3 = arith.constant 0 : index
    %c0_4 = arith.constant 0 : index
    %3 = vector.load %arg3[%c0_3, %c0_4] : memref<1x256xf32, #tpu.memory_space<vmem>>, vector<1x256xf32>
    %4 = vector.broadcast %3 : vector<1x256xf32> to vector<16x256xf32>
    %5 = arith.addf %2, %4 : vector<16x256xf32>
    %cst_5 = arith.constant 0.000000e+00 : f32
    %6 = vector.broadcast %cst_5 : f32 to vector<16x256xf32>
    %7 = arith.maximumf %5, %6 : vector<16x256xf32>
    %8 = arith.truncf %7 : vector<16x256xf32> to vector<16x256xbf16>
    %c0_6 = arith.constant 0 : index
    %c0_7 = arith.constant 0 : index
    %9 = vector.load %arg4[%c0_6, %c0_7] : memref<256x128xbf16, #tpu.memory_space<vmem>>, vector<256x128xbf16>
    %cst_8 = arith.constant dense<0.000000e+00> : vector<16x128xf32>
    %10 = tpu.matmul %8, %9, %cst_8 {dimension_numbers = #tpu.dot_dimension_numbers<[1], [0], [0], [1], [0, 0, 1, 1], [], []>} : vector<16x256xbf16>, vector<256x128xbf16>, vector<16x128xf32> -> vector<16x128xf32>
    %c0_9 = arith.constant 0 : index
    %c0_10 = arith.constant 0 : index
    %11 = vector.load %arg5[%c0_9, %c0_10] : memref<1x128xf32, #tpu.memory_space<vmem>>, vector<1x128xf32>
    %12 = vector.broadcast %11 : vector<1x128xf32> to vector<16x128xf32>
    %13 = arith.addf %10, %12 : vector<16x128xf32>
    %cst_11 = arith.constant 0.000000e+00 : f32
    %14 = vector.broadcast %cst_11 : f32 to vector<16x128xf32>
    %15 = arith.maximumf %13, %14 : vector<16x128xf32>
    %16 = arith.truncf %15 : vector<16x128xf32> to vector<16x128xbf16>
    %c0_12 = arith.constant 0 : index
    %c0_13 = arith.constant 0 : index
    %17 = vector.load %arg6[%c0_12, %c0_13] : memref<128x128xbf16, #tpu.memory_space<vmem>>, vector<128x128xbf16>
    %cst_14 = arith.constant dense<0.000000e+00> : vector<16x128xf32>
    %18 = tpu.matmul %16, %17, %cst_14 {dimension_numbers = #tpu.dot_dimension_numbers<[1], [0], [0], [1], [0, 0, 1, 1], [], []>} : vector<16x128xbf16>, vector<128x128xbf16>, vector<16x128xf32> -> vector<16x128xf32>
    %c0_15 = arith.constant 0 : index
    %c0_16 = arith.constant 0 : index
    %19 = vector.load %arg7[%c0_15, %c0_16] : memref<1x128xf32, #tpu.memory_space<vmem>>, vector<1x128xf32>
    %20 = vector.broadcast %19 : vector<1x128xf32> to vector<16x128xf32>
    %21 = arith.addf %18, %20 : vector<16x128xf32>
    %cst_17 = arith.constant dense<0xFF800000> : vector<16xf32>
    %22 = vector.multi_reduction <maximumf>, %21, %cst_17 [1] : vector<16x128xf32> to vector<16xf32>
    %23 = vector.shape_cast %22 : vector<16xf32> to vector<16x1xf32>
    %24 = vector.broadcast %23 : vector<16x1xf32> to vector<16x128xf32>
    %25 = arith.subf %21, %24 : vector<16x128xf32>
    %26 = math.exp %25 : vector<16x128xf32>
    %cst_18 = arith.constant dense<0.000000e+00> : vector<16xf32>
    %27 = vector.multi_reduction <add>, %26, %cst_18 [1] : vector<16x128xf32> to vector<16xf32>
    %28 = vector.shape_cast %27 : vector<16xf32> to vector<16x1xf32>
    %29 = tpu.reciprocal %28 {approx = true} : vector<16x1xf32> -> vector<16x1xf32>
    %30 = vector.broadcast %29 : vector<16x1xf32> to vector<16x128xf32>
    %31 = arith.mulf %26, %30 : vector<16x128xf32>
    %c0_19 = arith.constant 0 : index
    %c0_20 = arith.constant 0 : index
    %32 = vector.load %arg8[%c0_19, %c0_20] : memref<16x128xf32, #tpu.memory_space<vmem>>, vector<16x128xf32>
    tpu.vector_store %arg8[%c0_19, %c0_20], %31 {strides = array<i32>} : memref<16x128xf32, #tpu.memory_space<vmem>>, vector<16x128xf32>,
    return
  }
  func.func @transform_0(%arg0: i32) -> (i32, i32) {
    %c0_i32 = arith.constant 0 : i32
    %c0_i32_0 = arith.constant 0 : i32
    return %arg0, %c0_i32 : i32, i32
  }
  func.func @transform_1(%arg0: i32) -> (i32, i32) {
    %c0_i32 = arith.constant 0 : i32
    %c0_i32_0 = arith.constant 0 : i32
    %c0_i32_1 = arith.constant 0 : i32
    return %c0_i32, %c0_i32_0 : i32, i32
  }
  func.func @transform_2(%arg0: i32) -> (i32, i32) {
    %c0_i32 = arith.constant 0 : i32
    %c0_i32_0 = arith.constant 0 : i32
    %c0_i32_1 = arith.constant 0 : i32
    return %c0_i32, %c0_i32_0 : i32, i32
  }
  func.func @transform_3(%arg0: i32) -> (i32, i32) {
    %c0_i32 = arith.constant 0 : i32
    %c0_i32_0 = arith.constant 0 : i32
    %c0_i32_1 = arith.constant 0 : i32
    return %c0_i32, %c0_i32_0 : i32, i32
  }
  func.func @transform_4(%arg0: i32) -> (i32, i32) {
    %c0_i32 = arith.constant 0 : i32
    %c0_i32_0 = arith.constant 0 : i32
    %c0_i32_1 = arith.constant 0 : i32
    return %c0_i32, %c0_i32_0 : i32, i32
  }
  func.func @transform_5(%arg0: i32) -> (i32, i32) {
    %c0_i32 = arith.constant 0 : i32
    %c0_i32_0 = arith.constant 0 : i32
    %c0_i32_1 = arith.constant 0 : i32
    return %c0_i32, %c0_i32_0 : i32, i32
  }
  func.func @transform_6(%arg0: i32) -> (i32, i32) {
    %c0_i32 = arith.constant 0 : i32
    %c0_i32_0 = arith.constant 0 : i32
    %c0_i32_1 = arith.constant 0 : i32
    return %c0_i32, %c0_i32_0 : i32, i32
  }
  func.func @transform_7(%arg0: i32) -> (i32, i32) {
    %c0_i32 = arith.constant 0 : i32
    %c0_i32_0 = arith.constant 0 : i32
    return %arg0, %c0_i32 : i32, i32
  }
}

</mosaic_0001>

<bundles_post_ra>
// kernel: tpu_custom_call.1
= control target key start
LH: loop header
LB: loop body
LE: loop exit
PB: predicated region body
PF: predicated region fallthrough
CT: control target
= control target key end

     0   :  { %12 = vsyncpa [#allocation3], 0  ;;  %s2155_s0 = inlined_call_operand.hbm [shape: bf16[16,1024], index: 0, kind: input, shape index: {}]   ;;  %s2156_s1 = inlined_call_operand.hbm [shape: bf16[1024,256], index: 1, kind: input, shape index: {}]   ;;  %s2157_s2 = inlined_call_operand.vmem [shape: f32[1,256], index: 2, kind: input, shape index: {}]   ;;  %s2158_s3 = inlined_call_operand.hbm [shape: bf16[256,128], index: 3, kind: input, shape index: {}]   ;;  %s2159_s4 = inlined_call_operand.vmem [shape: f32[1,128], index: 4, kind: input, shape index: {}]   ;;  %s2160_s5 = inlined_call_operand.hbm [shape: bf16[128,128], index: 5, kind: input, shape index: {}]   ;;  %s2161_s6 = inlined_call_operand.vmem [shape: f32[1,128], index: 6, kind: input, shape index: {}]   ;;  %s2162_s7 = inlined_call_operand.hbm [shape: f32[16,128], index: 7, kind: output, shape index: {}]  }
   0x1   :  { %13 = vsyncpa [#allocation6], 0 }
   0x2   :  { %14 = vsyncpa [#allocation9], 0 }
   0x3   :  { %15 = vsyncpa [#allocation4], 0  ;;  %s2003_s24 = smov [#allocation5]   ;;  %s1885_s28 = scalar_lea.hbm %s2156_s1, 16384 }
   0x4   :  { %s33_s25 = sshll.u32 %s2003_s24, 4  ;;  %p1886_p0 = scmp.ne.s32.totalorder %s2156_s1, %s1885_s28  ;;  %s34_s25 = int_to_ptr.vmem [resolvable:$true] %s33_s25 }
   0x5   :  { %p1889_p1 = scmp.lt.u32.totalorder %s1885_s28, %s2156_s1 }
   0x7   :  { %p1891_p2 = pnand %p1889_p1, %p1886_p0 }
   0x9   :  { %1894 = shalt.err (!%p1891_p2)
}
   0xa   :  { %s1895_s10 = scalar_lea.vmem %s34_s25, 16384  ;;  %p1900_p4 = scmp.lt.s32.totalorder %s34_s25, %s34_s25 }
   0xb   :  { %p1896_p3 = scmp.ne.s32.totalorder %s34_s25, %s1895_s10  ;;  %p1901_p5 = scmp.lt.s32.totalorder %s1895_s10, %s1895_s10 }
   0xd   :  { %p1902_p6 = por %p1901_p5, %p1900_p4 }
   0xf   :  { %p1903_p7 = pnand %p1902_p6, %p1896_p3 }
  0x11   :  { %1906 = shalt.err (!%p1903_p7)
}
  0x12   :  { %s2004_s11 = smov 128   ;;  %s2005_s12 = smov 8  }
  0x13   :  { %39 = dma.hbm_to_vmem [thread:$0]  %s2156_s1, 16384, %s34_s25, [#allocation6], %s2004_s11, %s2004_s11, %s2005_s12  }
  0x14   :  { %s2006_s15 = smov [#allocation2]   ;;  %s1907_s19 = scalar_lea.hbm %s2155_s0, 1024 }
  0x15   :  { %s21_s16 = sshll.u32 %s2006_s15, 4  ;;  %p1908_p8 = scmp.ne.s32.totalorder %s2155_s0, %s1907_s19  ;;  %s22_s16 = int_to_ptr.vmem [resolvable:$true] %s21_s16 }
  0x16   :  { %p1911_p9 = scmp.lt.u32.totalorder %s1907_s19, %s2155_s0 }
  0x18   :  { %p1913_p10 = pnand %p1911_p9, %p1908_p8 }
  0x1a   :  { %1916 = shalt.err (!%p1913_p10)
}
  0x1b   :  { %s1917_s24 = scalar_lea.vmem %s22_s16, 1024  ;;  %p1922_p12 = scmp.lt.s32.totalorder %s22_s16, %s22_s16 }
  0x1c   :  { %p1918_p11 = scmp.ne.s32.totalorder %s22_s16, %s1917_s24  ;;  %p1923_p13 = scmp.lt.s32.totalorder %s1917_s24, %s1917_s24 }
  0x1e   :  { %p1924_p0 = por %p1923_p13, %p1922_p12 }
  0x20   :  { %p1925_p1 = pnand %p1924_p0, %p1918_p11 }
  0x22   :  { %1928 = shalt.err (!%p1925_p1)
}
  0x23   :  { %s2007_s1 = smov 512   ;;  %s2008_s25 = smov 32  }
  0x24   :  { %27 = dma.hbm_to_vmem [thread:$0]  %s2155_s0, 1024, %s22_s16, [#allocation3], %s2007_s1, %s2007_s1, %s2008_s25  }
  0x25   :  { %s2009_s28 = smov [#allocation7]   ;;  %s1929_s9 = scalar_lea.hbm %s2158_s3, 2048 }
  0x26   :  { %s47_s29 = sshll.u32 %s2009_s28, 4  ;;  %p1930_p2 = scmp.ne.s32.totalorder %s2158_s3, %s1929_s9  ;;  %s48_s29 = int_to_ptr.vmem [resolvable:$true] %s47_s29 }
  0x27   :  { %p1933_p3 = scmp.lt.u32.totalorder %s1929_s9, %s2158_s3 }
  0x29   :  { %p1935_p4 = pnand %p1933_p3, %p1930_p2 }
  0x2b   :  { %1938 = shalt.err (!%p1935_p4)
}
  0x2c   :  { %s1939_s17 = scalar_lea.vmem %s48_s29, 2048  ;;  %p1944_p6 = scmp.lt.s32.totalorder %s48_s29, %s48_s29 }
  0x2d   :  { %p1940_p5 = scmp.ne.s32.totalorder %s48_s29, %s1939_s17  ;;  %p1945_p7 = scmp.lt.s32.totalorder %s1939_s17, %s1939_s17 }
  0x2f   :  { %p1946_p8 = por %p1945_p7, %p1944_p6 }
  0x31   :  { %p1947_p9 = pnand %p1946_p8, %p1940_p5 }
  0x33   :  { %1950 = shalt.err (!%p1947_p9)
}
  0x34   :  { %s2010_s0 = smov 64   ;;  %s2011_s16 = smov 4  }
  0x35   :  { %53 = dma.hbm_to_vmem [thread:$0]  %s2158_s3, 2048, %s48_s29, [#allocation6], %s2010_s0, %s2010_s0, %s2011_s16  }
  0x36   :  { %s2012_s20 = smov [#allocation8]   ;;  %s1951_s24 = scalar_lea.hbm %s2160_s5, 1024 }
  0x37   :  { %s61_s21 = sshll.u32 %s2012_s20, 4  ;;  %p1952_p10 = scmp.ne.s32.totalorder %s2160_s5, %s1951_s24  ;;  %s62_s21 = int_to_ptr.vmem [resolvable:$true] %s61_s21 }
  0x38   :  { %p1955_p11 = scmp.lt.u32.totalorder %s1951_s24, %s2160_s5 }
  0x3a   :  { %p1957_p12 = pnand %p1955_p11, %p1952_p10 }
  0x3c   :  { %1960 = shalt.err (!%p1957_p12)
}
  0x3d   :  { %s1961_s28 = scalar_lea.vmem %s62_s21, 1024  ;;  %p1966_p0 = scmp.lt.s32.totalorder %s62_s21, %s62_s21 }
  0x3e   :  { %p1962_p13 = scmp.ne.s32.totalorder %s62_s21, %s1961_s28  ;;  %p1967_p1 = scmp.lt.s32.totalorder %s1961_s28, %s1961_s28 }
  0x40   :  { %p1968_p2 = por %p1967_p1, %p1966_p0 }
  0x42   :  { %p1969_p3 = pnand %p1968_p2, %p1962_p13 }
  0x44   :  { %1972 = shalt.err (!%p1969_p3)
}
  0x45   :  { %67 = dma.hbm_to_vmem [thread:$0]  %s2160_s5, 1024, %s62_s21, [#allocation9], %s2010_s0, %s2010_s0, %s2011_s16  }
  0x46   :  { %1995 = dma.done.wait [#allocation3], 1024  }
  0x47   :  { %1996 = vsyncadd [#allocation3], 4294966272 }
  0x48   :  { %1997 = dma.done.wait [#allocation6], 18432  }
  0x49   :  { %1998 = vsyncadd [#allocation6], 4294948864 }
  0x4a   :  { %1999 = dma.done.wait [#allocation9], 1024  }
  0x4b   :  { %2000 = vsyncadd [#allocation9], 4294966272  ;;  %v1661_v0 = vld [vmem:[#allocation5 + $0x104] ss:$8 sps:$4 sm:$0xff]   ;;  %v1663_v1 = vld [vmem:[#allocation5 + $0x100] ss:$8 sps:$4 sm:$0xff]  }
  0x4c   :  { %954 = vmatprep.subr.bf16.mxu0 %v1661_v0  ;;  %v1664_v2 = vld [vmem:[#allocation5 + $0x114] ss:$8 sps:$4 sm:$0xff]   ;;  %v1666_v3 = vld [vmem:[#allocation5 + $0x110] ss:$8 sps:$4 sm:$0xff]   ;;  %v1667_v4 = vld [vmem:[#allocation5 + $0x124] ss:$8 sps:$4 sm:$0xff]  }
  0x4d   :  { %955 = vmatpush1.bf16.msra.mxu0 %v1663_v1  ;;  %v1669_v5 = vld [vmem:[#allocation5 + $0x120] ss:$8 sps:$4 sm:$0xff]   ;;  %v1670_v6 = vld [vmem:[#allocation5 + $0x134] ss:$8 sps:$4 sm:$0xff]   ;;  %v1672_v7 = vld [vmem:[#allocation5 + $0x130] ss:$8 sps:$4 sm:$0xff]  }
  0x4e   :  { %956 = vmatprep.subr.bf16.mxu0 %v1664_v2  ;;  %v1673_v8 = vld [vmem:[#allocation5 + $0x144] ss:$8 sps:$4 sm:$0xff]   ;;  %v1675_v9 = vld [vmem:[#allocation5 + $0x140] ss:$8 sps:$4 sm:$0xff]   ;;  %v1676_v10 = vld [vmem:[#allocation5 + $0x154] ss:$8 sps:$4 sm:$0xff]  }
  0x4f   :  { %v1678_v11 = vld [vmem:[#allocation5 + $0x150] ss:$8 sps:$4 sm:$0xff]   ;;  %v1679_v12 = vld [vmem:[#allocation5 + $0x164] ss:$8 sps:$4 sm:$0xff]   ;;  %v1681_v16 = vld [vmem:[#allocation5 + $0x160] ss:$8 sps:$4 sm:$0xff]  }
  0x50   :  { %v2107_v13 = vld [vmem:[#allocation2 + $0x8] sm:$0xff]  ;;  %v1682_v17 = vld [vmem:[#allocation5 + $0x174] ss:$8 sps:$4 sm:$0xff]   ;;  %v1684_v18 = vld [vmem:[#allocation5 + $0x170] ss:$8 sps:$4 sm:$0xff]   ;;  %vm2014_vm0 = vmmov 0  }
  0x51   :  { %957 = vmatpush1.bf16.msra.mxu0 %v1666_v3  ;;  %v2109_v14 = vld [vmem:[#allocation2 + $0x28] sm:$0xff]  ;;  %v1688_v21 = vld [vmem:[#allocation5 + $0x194] ss:$8 sps:$4 sm:$0xff]   ;;  %v1690_v22 = vld [vmem:[#allocation5 + $0x190] ss:$8 sps:$4 sm:$0xff]  }
  0x52   :  { %958 = vmatprep.subr.bf16.mxu0 %v1667_v4  ;;  %v1422_v15 = vcombine.high %v2107_v13, %v2109_v14  ;;  %v1685_v19 = vld [vmem:[#allocation5 + $0x184] ss:$8 sps:$4 sm:$0xff]   ;;  %v1687_v20 = vld [vmem:[#allocation5 + $0x180] ss:$8 sps:$4 sm:$0xff]   ;;  %v1694_v25 = vld [vmem:[#allocation5 + $0x1b4] ss:$8 sps:$4 sm:$0xff]   ;;  %v1421_v50 = vcombine.low %v2107_v13, %v2109_v14 }
  0x53   :  { %v1691_v23 = vld [vmem:[#allocation5 + $0x1a4] ss:$8 sps:$4 sm:$0xff]   ;;  %v1693_v24 = vld [vmem:[#allocation5 + $0x1a0] ss:$8 sps:$4 sm:$0xff]   ;;  %v1696_v26 = vld [vmem:[#allocation5 + $0x1b0] ss:$8 sps:$4 sm:$0xff]  }
  0x54   :  { %986 = vmatprep.mubr.bf16.mxu0 %v1422_v15  ;;  %v1754_v27 = vld [vmem:[#allocation5 + $0x4] ss:$8 sps:$4 sm:$0xff]   ;;  %v1756_v28 = vld [vmem:[#allocation5] ss:$8 sps:$4 sm:$0xff]   ;;  %v1760_v30 = vld [vmem:[#allocation5 + $0x14] ss:$8 sps:$4 sm:$0xff]  }
  0x55   :  { %959 = vmatpush1.bf16.msra.mxu0 %v1669_v5  ;;  %v1697_v29 = vld [vmem:[#allocation5 + $0x1c4] ss:$8 sps:$4 sm:$0xff]   ;;  %911 = vmatprep.subr.bf16.mxu1 %v1754_v27  ;;  %v1762_v31 = vld [vmem:[#allocation5 + $0x10] ss:$8 sps:$4 sm:$0xff]   ;;  %v1699_v32 = vld [vmem:[#allocation5 + $0x1c0] ss:$8 sps:$4 sm:$0xff]  }
  0x56   :  { %960 = vmatprep.subr.bf16.mxu0 %v1670_v6  ;;  %912 = vmatpush1.bf16.msra.mxu1 %v1756_v28  ;;  %v1700_v33 = vld [vmem:[#allocation5 + $0x1d4] ss:$8 sps:$4 sm:$0xff]   ;;  %v1766_v34 = vld [vmem:[#allocation5 + $0x24] ss:$8 sps:$4 sm:$0xff]   ;;  %v1768_v35 = vld [vmem:[#allocation5 + $0x20] ss:$8 sps:$4 sm:$0xff]  }
  0x57   :  { %913 = vmatprep.subr.bf16.mxu1 %v1760_v30  ;;  %v1702_v36 = vld [vmem:[#allocation5 + $0x1d0] ss:$8 sps:$4 sm:$0xff]   ;;  %v1772_v37 = vld [vmem:[#allocation5 + $0x34] ss:$8 sps:$4 sm:$0xff]   ;;  %v1703_v38 = vld [vmem:[#allocation5 + $0x1e4] ss:$8 sps:$4 sm:$0xff]  }
  0x58   :  { %v1774_v39 = vld [vmem:[#allocation5 + $0x30] ss:$8 sps:$4 sm:$0xff]   ;;  %v1778_v40 = vld [vmem:[#allocation5 + $0x44] ss:$8 sps:$4 sm:$0xff]   ;;  %v1705_v41 = vld [vmem:[#allocation5 + $0x1e0] ss:$8 sps:$4 sm:$0xff]  }
  0x59   :  { %961 = vmatpush1.bf16.msra.mxu0 %v1672_v7  ;;  %v1706_v42 = vld [vmem:[#allocation5 + $0x1f4] ss:$8 sps:$4 sm:$0xff]   ;;  %v1780_v43 = vld [vmem:[#allocation5 + $0x40] ss:$8 sps:$4 sm:$0xff]   ;;  %v1708_v44 = vld [vmem:[#allocation5 + $0x1f0] ss:$8 sps:$4 sm:$0xff]  }
  0x5a   :  { %962 = vmatprep.subr.bf16.mxu0 %v1673_v8  ;;  %914 = vmatpush1.bf16.msra.mxu1 %v1762_v31  ;;  %v1784_v45 = vld [vmem:[#allocation5 + $0x54] ss:$8 sps:$4 sm:$0xff]   ;;  %v1711_v46 = vld [vmem:[#allocation5 + $0x204] ss:$8 sps:$4 sm:$0xff]   ;;  %v1786_v49 = vld [vmem:[#allocation5 + $0x50] ss:$8 sps:$4 sm:$0xff]  }
  0x5b   :  { %915 = vmatprep.subr.bf16.mxu1 %v1766_v34  ;;  %v2113_v47 = vld [vmem:[#allocation2 + $0x10] sm:$0xff]  ;;  %v1790_v51 = vld [vmem:[#allocation5 + $0x64] ss:$8 sps:$4 sm:$0xff]   ;;  %v1709_v52 = vld [vmem:[#allocation5 + $0x200] ss:$8 sps:$4 sm:$0xff]  }
  0x5c   :  { %v2115_v48 = vld [vmem:[#allocation2 + $0x30] sm:$0xff]  ;;  %v1792_v55 = vld [vmem:[#allocation5 + $0x60] ss:$8 sps:$4 sm:$0xff]   ;;  %v1717_v58 = vld [vmem:[#allocation5 + $0x224] ss:$8 sps:$4 sm:$0xff]  }
  0x5d   :  { %963 = vmatpush1.bf16.msra.mxu0 %v1675_v9  ;;  %v1424_v53 = vcombine.high %v2113_v47, %v2115_v48  ;;  %v1714_v54 = vld [vmem:[#allocation5 + $0x214] ss:$8 sps:$4 sm:$0xff]   ;;  %v1712_v57 = vld [vmem:[#allocation5 + $0x210] ss:$8 sps:$4 sm:$0xff]   ;;  %v1802_v60 = vld [vmem:[#allocation5 + $0x84] ss:$8 sps:$4 sm:$0xff]  }
  0x5e   :  { %964 = vmatprep.subr.bf16.mxu0 %v1676_v10  ;;  %916 = vmatpush1.bf16.msra.mxu1 %v1768_v35  ;;  %v1796_v56 = vld [vmem:[#allocation5 + $0x74] ss:$8 sps:$4 sm:$0xff]   ;;  %v1798_v59 = vld [vmem:[#allocation5 + $0x70] ss:$8 sps:$4 sm:$0xff]   ;;  %v1715_v61 = vld [vmem:[#allocation5 + $0x220] ss:$8 sps:$4 sm:$0xff]  }
  0x5f   :  { %917 = vmatprep.subr.bf16.mxu1 %v1772_v37  ;;  %v1720_v62 = vld [vmem:[#allocation5 + $0x234] ss:$8 sps:$4 sm:$0xff]   ;;  %v1804_v63 = vld [vmem:[#allocation5 + $0x80] ss:$8 sps:$4 sm:$0xff]   ;;  %v1718_v1 = vld [vmem:[#allocation5 + $0x230] ss:$8 sps:$4 sm:$0xff]  }
  0x60   :  { %v1808_v0 = vld [vmem:[#allocation5 + $0x94] ss:$8 sps:$4 sm:$0xff]   ;;  %v1723_v2 = vld [vmem:[#allocation5 + $0x244] ss:$8 sps:$4 sm:$0xff]   ;;  %v1810_v3 = vld [vmem:[#allocation5 + $0x90] ss:$8 sps:$4 sm:$0xff]  }
  0x61   :  { %965 = vmatpush1.bf16.msra.mxu0 %v1678_v11  ;;  %v1814_v4 = vld [vmem:[#allocation5 + $0xa4] ss:$8 sps:$4 sm:$0xff]   ;;  %v1721_v5 = vld [vmem:[#allocation5 + $0x240] ss:$8 sps:$4 sm:$0xff]   ;;  %v1726_v6 = vld [vmem:[#allocation5 + $0x254] ss:$8 sps:$4 sm:$0xff]  }
  0x62   :  { %966 = vmatprep.subr.bf16.mxu0 %v1679_v12  ;;  %918 = vmatpush1.bf16.msra.mxu1 %v1774_v39  ;;  %v1816_v7 = vld [vmem:[#allocation5 + $0xa0] ss:$8 sps:$4 sm:$0xff]   ;;  %v1820_v8 = vld [vmem:[#allocation5 + $0xb4] ss:$8 sps:$4 sm:$0xff]   ;;  %v1724_v9 = vld [vmem:[#allocation5 + $0x250] ss:$8 sps:$4 sm:$0xff]  }
  0x63   :  { %919 = vmatprep.subr.bf16.mxu1 %v1778_v40  ;;  %v1729_v10 = vld [vmem:[#allocation5 + $0x264] ss:$8 sps:$4 sm:$0xff]   ;;  %v1822_v11 = vld [vmem:[#allocation5 + $0xb0] ss:$8 sps:$4 sm:$0xff]   ;;  %v1844_v27 = vld [vmem:[#allocation5 + $0xf4] ss:$8 sps:$4 sm:$0xff]  }
  0x64   :  { %v83_v12 = vld [vmem:[#allocation2] sm:$0xff]  ;;  %v1736_v28 = vld [vmem:[#allocation5 + $0x290] ss:$8 sps:$4 sm:$0xff]   ;;  %v1856_v39 = vld [vmem:[#allocation7 + $0x8] sm:$0xff]  }
  0x65   :  { %967 = vmatpush1.bf16.msra.mxu0 %v1681_v16  ;;  %v87_v13 = vld [vmem:[#allocation2 + $0x20] sm:$0xff]  ;;  %v1846_v30 = vld [vmem:[#allocation5 + $0xf0] ss:$8 sps:$4 sm:$0xff]  }
  0x66   :  { %968 = vmatprep.subr.bf16.mxu0 %v1682_v17  ;;  %920 = vmatpush1.bf16.msra.mxu1 %v1780_v43  ;;  %v1826_v14 = vld [vmem:[#allocation5 + $0xc4] ss:$8 sps:$4 sm:$0xff]   ;;  %v1420_v15 = vcombine.high %v83_v12, %v87_v13  ;;  %v1727_v16 = vld [vmem:[#allocation5 + $0x260] ss:$8 sps:$4 sm:$0xff]   ;;  %v1732_v17 = vld [vmem:[#allocation5 + $0x274] ss:$8 sps:$4 sm:$0xff]   ;;  %v1419_v35 = vcombine.low %v83_v12, %v87_v13 }
  0x67   :  { %921 = vmatprep.subr.bf16.mxu1 %v1784_v45  ;;  %v1853_v31 = vld [vmem:[#allocation7 + $0x40] sm:$0xff]   ;;  %v1742_v37 = vld [vmem:[#allocation5 + $0x2b0] ss:$8 sps:$4 sm:$0xff]   ;;  %v1831_v13 = vld [vmem:[#allocation5 + $0x3b4] ss:$8 sps:$4 sm:$0xff]  }
  0x68   :  { %943 = vmatprep.mubr.bf16.mxu1 %v1420_v15  ;;  %v1854_v34 = vld [vmem:[#allocation7] sm:$0xff]   ;;  %v1857_v40 = vld [vmem:[#allocation7 + $0x50] sm:$0xff]  }
  0x69   :  { %969 = vmatpush1.bf16.msra.mxu0 %v1684_v18  ;;  %v1828_v18 = vld [vmem:[#allocation5 + $0xc0] ss:$8 sps:$4 sm:$0xff]   ;;  %v1858_v43 = vld [vmem:[#allocation7 + $0x10] sm:$0xff]   ;;  %v1837_v15 = vld [vmem:[#allocation5 + $0x3c4] ss:$8 sps:$4 sm:$0xff]  }
  0x6a   :  { %970 = vmatprep.subr.bf16.mxu0 %v1685_v19  ;;  %922 = vmatpush1.bf16.msra.mxu1 %v1786_v49  ;;  %v1832_v19 = vld [vmem:[#allocation5 + $0xd4] ss:$8 sps:$4 sm:$0xff]   ;;  %v1748_v45 = vld [vmem:[#allocation5 + $0x2d0] ss:$8 sps:$4 sm:$0xff]   ;;  %v1823_v12 = vld [vmem:[#allocation5 + $0x3a0] ss:$8 sps:$4 sm:$0xff]  }
  0x6b   :  { %923 = vmatprep.subr.bf16.mxu1 %v1790_v51  ;;  %v1860_v49 = vld [vmem:[#allocation7 + $0x18] sm:$0xff]  }
  0x6c   :  { %v1759_v51 = vld [vmem:[#allocation5 + $0x2f4] ss:$8 sps:$4 sm:$0xff]  }
  0x6d   :  { %971 = vmatpush1.bf16.msra.mxu0 %v1687_v20  ;;  %v1730_v20 = vld [vmem:[#allocation5 + $0x270] ss:$8 sps:$4 sm:$0xff]  }
  0x6e   :  { %972 = vmatprep.subr.bf16.mxu0 %v1688_v21  ;;  %924 = vmatpush1.bf16.msra.mxu1 %v1792_v55  ;;  %v1735_v21 = vld [vmem:[#allocation5 + $0x284] ss:$8 sps:$4 sm:$0xff]   ;;  %v2123_v55 = vld [vmem:[#allocation2 + $0x38] sm:$0xff] }
  0x6f   :  { %925 = vmatprep.subr.bf16.mxu1 %v1796_v56  ;;  %v1423_v56 = vcombine.low %v2113_v47, %v2115_v48  ;;  %v1789_v47 = vld [vmem:[#allocation5 + $0x344] ss:$8 sps:$4 sm:$0xff]   ;;  %v1787_v48 = vld [vmem:[#allocation5 + $0x340] ss:$8 sps:$4 sm:$0xff]  }
  0x71   :  { %973 = vmatpush1.bf16.msra.mxu0 %v1690_v22  ;;  %v1733_v22 = vld [vmem:[#allocation5 + $0x280] ss:$8 sps:$4 sm:$0xff]  }
  0x72   :  { %974 = vmatprep.subr.bf16.mxu0 %v1691_v23  ;;  %926 = vmatpush1.bf16.msra.mxu1 %v1798_v59  ;;  %v1834_v23 = vld [vmem:[#allocation5 + $0xd0] ss:$8 sps:$4 sm:$0xff]   ;;  %v1771_v59 = vld [vmem:[#allocation5 + $0x314] ss:$8 sps:$4 sm:$0xff]  }
  0x73   :  { %927 = vmatprep.subr.bf16.mxu1 %v1802_v60  ;;  %v1769_v60 = vld [vmem:[#allocation5 + $0x310] ss:$8 sps:$4 sm:$0xff]  }
  0x75   :  { %975 = vmatpush1.bf16.msra.mxu0 %v1693_v24  ;;  %v1738_v24 = vld [vmem:[#allocation5 + $0x294] ss:$8 sps:$4 sm:$0xff]  }
  0x76   :  { %976 = vmatprep.subr.bf16.mxu0 %v1694_v25  ;;  %928 = vmatpush1.bf16.msra.mxu1 %v1804_v63  ;;  %v1838_v25 = vld [vmem:[#allocation5 + $0xe4] ss:$8 sps:$4 sm:$0xff]   ;;  %v1783_v63 = vld [vmem:[#allocation5 + $0x334] ss:$8 sps:$4 sm:$0xff]  }
  0x77   :  { %929 = vmatprep.subr.bf16.mxu1 %v1808_v0  ;;  %v1781_v0 = vld [vmem:[#allocation5 + $0x330] ss:$8 sps:$4 sm:$0xff]  }
  0x79   :  { %977 = vmatpush1.bf16.msra.mxu0 %v1696_v26  ;;  %v1840_v26 = vld [vmem:[#allocation5 + $0xe0] ss:$8 sps:$4 sm:$0xff]  }
  0x7a   :  { %978 = vmatprep.subr.bf16.mxu0 %v1697_v29  ;;  %930 = vmatpush1.bf16.msra.mxu1 %v1810_v3  ;;  %v1741_v29 = vld [vmem:[#allocation5 + $0x2a4] ss:$8 sps:$4 sm:$0xff]  }
  0x7b   :  { %931 = vmatprep.subr.bf16.mxu1 %v1814_v4  ;;  %v1801_v3 = vld [vmem:[#allocation5 + $0x364] ss:$8 sps:$4 sm:$0xff]   ;;  %v1799_v4 = vld [vmem:[#allocation5 + $0x360] ss:$8 sps:$4 sm:$0xff]  }
  0x7d   :  { %979 = vmatpush1.bf16.msra.mxu0 %v1699_v32  ;;  %v1739_v32 = vld [vmem:[#allocation5 + $0x2a0] ss:$8 sps:$4 sm:$0xff]  }
  0x7e   :  { %980 = vmatprep.subr.bf16.mxu0 %v1700_v33  ;;  %932 = vmatpush1.bf16.msra.mxu1 %v1816_v7  ;;  %v1744_v33 = vld [vmem:[#allocation5 + $0x2b4] ss:$8 sps:$4 sm:$0xff]   ;;  %v1813_v7 = vld [vmem:[#allocation5 + $0x384] ss:$8 sps:$4 sm:$0xff]  }
  0x7f   :  { %933 = vmatprep.subr.bf16.mxu1 %v1820_v8  ;;  %v1811_v8 = vld [vmem:[#allocation5 + $0x380] ss:$8 sps:$4 sm:$0xff]  }
  0x81   :  { %981 = vmatpush1.bf16.msra.mxu0 %v1702_v36  ;;  %v1855_v36 = vld [vmem:[#allocation7 + $0x48] sm:$0xff]  }
  0x82   :  { %982 = vmatprep.subr.bf16.mxu0 %v1703_v38  ;;  %934 = vmatpush1.bf16.msra.mxu1 %v1822_v11  ;;  %v1747_v38 = vld [vmem:[#allocation5 + $0x2c4] ss:$8 sps:$4 sm:$0xff]  }
  0x83   :  { %935 = vmatprep.subr.bf16.mxu1 %v1826_v14  ;;  %v1825_v11 = vld [vmem:[#allocation5 + $0x3a4] ss:$8 sps:$4 sm:$0xff]   ;;  %v1829_v14 = vld [vmem:[#allocation5 + $0x3b0] ss:$8 sps:$4 sm:$0xff]  }
  0x85   :  { %983 = vmatpush1.bf16.msra.mxu0 %v1705_v41  ;;  %v1745_v41 = vld [vmem:[#allocation5 + $0x2c0] ss:$8 sps:$4 sm:$0xff]  }
  0x86   :  { %984 = vmatprep.subr.bf16.mxu0 %v1706_v42  ;;  %936 = vmatpush1.bf16.msra.mxu1 %v1828_v18  ;;  %v1750_v42 = vld [vmem:[#allocation5 + $0x2d4] ss:$8 sps:$4 sm:$0xff]   ;;  %v1841_v18 = vld [vmem:[#allocation5 + $0x3d0] ss:$8 sps:$4 sm:$0xff]  }
  0x87   :  { %937 = vmatprep.subr.bf16.mxu1 %v1832_v19  ;;  %v1849_v19 = vld [vmem:[#allocation5 + $0x3e4] ss:$8 sps:$4 sm:$0xff]  }
  0x89   :  { %985 = vmatpush1.bf16.msra.mxu0 %v1708_v44  ;;  %v1859_v44 = vld [vmem:[#allocation7 + $0x58] sm:$0xff]  }
  0x8a   :  { %997 = vmatprep.subr.bf16.mxu0 %v1711_v46  ;;  %938 = vmatpush1.bf16.msra.mxu1 %v1834_v23  ;;  %v1753_v46 = vld [vmem:[#allocation5 + $0x2e4] ss:$8 sps:$4 sm:$0xff]  }
  0x8b   :  { %939 = vmatprep.subr.bf16.mxu1 %v1838_v25  ;;  %v1862_v25 = vld [vmem:[#allocation7 + $0x20] sm:$0xff]  }
  0x8c   :  { %987 = vmatmul.mubr.bf16.vlgmr.msra.gmra.mrb[0].mxu0 %v1421_v50  ;;  %v1751_v50 = vld [vmem:[#allocation5 + $0x2e0] ss:$8 sps:$4 sm:$0xff]  }
  0x8d   :  { %998 = vmatpush1.bf16.msra.mxu0 %v1709_v52  ;;  %1029 = vmatprep.mubr.bf16.mxu0 %v1424_v53  ;;  %v1757_v52 = vld [vmem:[#allocation5 + $0x2f0] ss:$8 sps:$4 sm:$0xff]   ;;  %v1765_v53 = vld [vmem:[#allocation5 + $0x304] ss:$8 sps:$4 sm:$0xff]  }
  0x8e   :  { %999 = vmatprep.subr.bf16.mxu0 %v1714_v54  ;;  %940 = vmatpush1.bf16.msra.mxu1 %v1840_v26  ;;  %v2121_v54 = vld [vmem:[#allocation2 + $0x18] sm:$0xff]  ;;  %v1863_v26 = vld [vmem:[#allocation7 + $0x68] sm:$0xff]  }
  0x8f   :  { %941 = vmatprep.subr.bf16.mxu1 %v1844_v27  ;;  %v1425_v23 = vcombine.low %v2121_v54, %v2123_v55  ;;  %v1864_v27 = vld [vmem:[#allocation7 + $0x28] sm:$0xff]  }
  0x91   :  { %1000 = vmatpush1.bf16.msra.mxu0 %v1712_v57  ;;  %v1763_v57 = vld [vmem:[#allocation5 + $0x300] ss:$8 sps:$4 sm:$0xff]  }
  0x92   :  { %1001 = vmatprep.subr.bf16.mxu0 %v1717_v58  ;;  %942 = vmatpush1.bf16.msra.mxu1 %v1846_v30  ;;  %v1426_v58 = vcombine.high %v2121_v54, %v2123_v55  ;;  %v1867_v30 = vld [vmem:[#allocation7 + $0x78] sm:$0xff]  }
  0x93   :  { %1581 = vmatprep.subr.bf16.mxu1 %v1853_v31  ;;  %v1868_v31 = vld [vmem:[#allocation7 + $0x38] sm:$0xff]  }
  0x95   :  { %1002 = vmatpush1.bf16.msra.mxu0 %v1715_v61  ;;  %944 = vmatmul.mubr.bf16.vlgmr.msra.gmra.mrb[0].mxu1 %v1419_v35  ;;  %v1777_v61 = vld [vmem:[#allocation5 + $0x324] ss:$8 sps:$4 sm:$0xff]  }
  0x96   :  { %1003 = vmatprep.subr.bf16.mxu0 %v1720_v62  ;;  %1582 = vmatpush3.bf16.msra.mxu1 %v1854_v34  ;;  %v1775_v62 = vld [vmem:[#allocation5 + $0x320] ss:$8 sps:$4 sm:$0xff]  }
  0x97   :  { %1583 = vmatprep.subr.bf16.mxu1 %v1855_v36 }
  0x99   :  { %1004 = vmatpush1.bf16.msra.mxu0 %v1718_v1  ;;  %v1795_v1 = vld [vmem:[#allocation5 + $0x354] ss:$8 sps:$4 sm:$0xff]  }
  0x9a   :  { %1005 = vmatprep.subr.bf16.mxu0 %v1723_v2  ;;  %1584 = vmatpush3.bf16.msra.mxu1 %v1856_v39  ;;  %v1793_v2 = vld [vmem:[#allocation5 + $0x350] ss:$8 sps:$4 sm:$0xff]  }
  0x9b   :  { %1585 = vmatprep.subr.bf16.mxu1 %v1857_v40  ;;  %v219_v40 = vld [vmem:[%s2157_s2] sm:$0x3] }
  0x9d   :  { %1006 = vmatpush1.bf16.msra.mxu0 %v1721_v5  ;;  %v1807_v5 = vld [vmem:[#allocation5 + $0x374] ss:$8 sps:$4 sm:$0xff]  }
  0x9e   :  { %1007 = vmatprep.subr.bf16.mxu0 %v1726_v6  ;;  %1586 = vmatpush3.bf16.msra.mxu1 %v1858_v43  ;;  %v1805_v6 = vld [vmem:[#allocation5 + $0x370] ss:$8 sps:$4 sm:$0xff]  }
  0x9f   :  { %1587 = vmatprep.subr.bf16.mxu1 %v1859_v44 }
  0xa1   :  { %1008 = vmatpush1.bf16.msra.mxu0 %v1724_v9  ;;  %v1819_v9 = vld [vmem:[#allocation5 + $0x394] ss:$8 sps:$4 sm:$0xff]  }
  0xa2   :  { %1009 = vmatprep.subr.bf16.mxu0 %v1729_v10  ;;  %1588 = vmatpush3.bf16.msra.mxu1 %v1860_v49  ;;  %v1817_v10 = vld [vmem:[#allocation5 + $0x390] ss:$8 sps:$4 sm:$0xff]  }
  0xa5   :  { %1010 = vmatpush1.bf16.msra.mxu0 %v1727_v16  ;;  %v1835_v16 = vld [vmem:[#allocation5 + $0x3c0] ss:$8 sps:$4 sm:$0xff]  }
  0xa6   :  { %1011 = vmatprep.subr.bf16.mxu0 %v1732_v17  ;;  %v1843_v17 = vld [vmem:[#allocation5 + $0x3d4] ss:$8 sps:$4 sm:$0xff]  }
  0xa9   :  { %1012 = vmatpush1.bf16.msra.mxu0 %v1730_v20  ;;  %v1847_v20 = vld [vmem:[#allocation5 + $0x3e0] ss:$8 sps:$4 sm:$0xff]  }
  0xaa   :  { %1013 = vmatprep.subr.bf16.mxu0 %v1735_v21  ;;  %v1852_v21 = vld [vmem:[#allocation5 + $0x3f4] ss:$8 sps:$4 sm:$0xff]  }
  0xad   :  { %1014 = vmatpush1.bf16.msra.mxu0 %v1733_v22  ;;  %v1850_v22 = vld [vmem:[#allocation5 + $0x3f0] ss:$8 sps:$4 sm:$0xff]  }
  0xae   :  { %1015 = vmatprep.subr.bf16.mxu0 %v1738_v24  ;;  %v1861_v24 = vld [vmem:[#allocation7 + $0x60] sm:$0xff]  }
  0xaf   :  { %1589 = vmatprep.subr.bf16.mxu1 %v1861_v24 }
  0xb0   :  { %1590 = vmatpush3.bf16.msra.mxu1 %v1862_v25 }
  0xb1   :  { %1016 = vmatpush1.bf16.msra.mxu0 %v1736_v28  ;;  %1591 = vmatprep.subr.bf16.mxu1 %v1863_v26  ;;  %v1865_v28 = vld [vmem:[#allocation7 + $0x70] sm:$0xff]  }
  0xb2   :  { %1017 = vmatprep.subr.bf16.mxu0 %v1741_v29  ;;  %v1866_v29 = vld [vmem:[#allocation7 + $0x30] sm:$0xff]  }
  0xb4   :  { %1592 = vmatpush3.bf16.msra.mxu1 %v1864_v27 }
  0xb5   :  { %1018 = vmatpush1.bf16.msra.mxu0 %v1739_v32  ;;  %1593 = vmatprep.subr.bf16.mxu1 %v1865_v28  ;;  %v2013_v32 = vmov 0.0  }
  0xb6   :  { %1019 = vmatprep.subr.bf16.mxu0 %v1744_v33 }
  0xb8   :  { %1594 = vmatpush3.bf16.msra.mxu1 %v1866_v29 }
  0xb9   :  { %1020 = vmatpush1.bf16.msra.mxu0 %v1742_v37  ;;  %1595 = vmatprep.subr.bf16.mxu1 %v1867_v30  ;;  %v221_v37 = vlaneseq }
  0xba   :  { %1021 = vmatprep.subr.bf16.mxu0 %v1747_v38 }
  0xbb   :  { %v222_v38 = vshrl.u32 %v221_v37, 7 }
  0xbc   :  { %1596 = vmatpush3.bf16.msra.mxu1 %v1868_v31 }
  0xbd   :  { %1022 = vmatpush1.bf16.msra.mxu0 %v1745_v41  ;;  %1612 = vmatprep.subr.bf16.mxu1 %v2013_v32  ;;  %v223_v39 = vsub.s32 0, %v222_v38  ;;  %v227_v41 = vsub.s32 1, %v222_v38 }
  0xbe   :  { %1023 = vmatprep.subr.bf16.mxu0 %v1750_v42 }
  0xbf   :  { %v224_v42 = vrot.slane %v219_v40, %v223_v39  ;;  %v228_v43 = vrot.slane %v219_v40, %v227_v41 }
  0xc1   :  { %1024 = vmatpush1.bf16.msra.mxu0 %v1748_v45 }
  0xc2   :  { %1025 = vmatprep.subr.bf16.mxu0 %v1753_v46 }
  0xc5   :  { %1026 = vmatpush1.bf16.msra.mxu0 %v1751_v50 }
  0xc6   :  { %1027 = vmatprep.subr.bf16.mxu0 %v1759_v51 }
  0xc9   :  { %1028 = vmatpush1.bf16.msra.mxu0 %v1757_v52 }
  0xca   :  { %1040 = vmatprep.subr.bf16.mxu0 %v1765_v53 }
  0xcc   :  { %1030 = vmatmul.mubr.bf16.vlgmr.msra.gmra.mrb[0].mxu0 %v1423_v56 }
  0xcd   :  { %1041 = vmatpush1.bf16.msra.mxu0 %v1763_v57  ;;  %1072 = vmatprep.mubr.bf16.mxu0 %v1426_v58 }
  0xce   :  { %1042 = vmatprep.subr.bf16.mxu0 %v1771_v59 }
  0xd1   :  { %1043 = vmatpush1.bf16.msra.mxu0 %v1769_v60 }
  0xd2   :  { %1044 = vmatprep.subr.bf16.mxu0 %v1777_v61 }
  0xd5   :  { %1045 = vmatpush1.bf16.msra.mxu0 %v1775_v62 }
  0xd6   :  { %1046 = vmatprep.subr.bf16.mxu0 %v1783_v63 }
  0xd9   :  { %1047 = vmatpush1.bf16.msra.mxu0 %v1781_v0  ;;  %v1869_v0 = vld [vmem:[#allocation8] sm:$0xff]  }
  0xda   :  { %1048 = vmatprep.subr.bf16.mxu0 %v1789_v47  ;;  %v1870_v47 = vld [vmem:[#allocation8 + $0x8] sm:$0xff]  }
  0xdd   :  { %1049 = vmatpush1.bf16.msra.mxu0 %v1787_v48  ;;  %v1871_v48 = vld [vmem:[#allocation8 + $0x10] sm:$0xff]  }
  0xde   :  { %1050 = vmatprep.subr.bf16.mxu0 %v1795_v1  ;;  %v1872_v1 = vld [vmem:[#allocation8 + $0x18] sm:$0xff]  }
  0xe1   :  { %1051 = vmatpush1.bf16.msra.mxu0 %v1793_v2  ;;  %v1873_v2 = vld [vmem:[#allocation8 + $0x20] sm:$0xff]  }
  0xe2   :  { %1052 = vmatprep.subr.bf16.mxu0 %v1801_v3  ;;  %v1874_v3 = vld [vmem:[#allocation8 + $0x28] sm:$0xff]  }
  0xe5   :  { %1053 = vmatpush1.bf16.msra.mxu0 %v1799_v4  ;;  %v1875_v4 = vld [vmem:[#allocation8 + $0x30] sm:$0xff]  }
  0xe6   :  { %1054 = vmatprep.subr.bf16.mxu0 %v1807_v5  ;;  %v1876_v5 = vld [vmem:[#allocation8 + $0x38] sm:$0xff]  }
  0xe9   :  { %1055 = vmatpush1.bf16.msra.mxu0 %v1805_v6 }
  0xea   :  { %1056 = vmatprep.subr.bf16.mxu0 %v1813_v7  ;;  %v1555_v7 = vld [vmem:[%s2159_s4] ss:$0 sm:$0xff]  ;;  %s2015_s4 = smov [#allocation10]  }
  0xed   :  { %1057 = vmatpush1.bf16.msra.mxu0 %v1811_v8 }
  0xee   :  { %1058 = vmatprep.subr.bf16.mxu0 %v1819_v9 }
  0xf1   :  { %1059 = vmatpush1.bf16.msra.mxu0 %v1817_v10 }
  0xf2   :  { %1060 = vmatprep.subr.bf16.mxu0 %v1825_v11 }
  0xf5   :  { %1061 = vmatpush1.bf16.msra.mxu0 %v1823_v12 }
  0xf6   :  { %1062 = vmatprep.subr.bf16.mxu0 %v1831_v13 }
  0xf9   :  { %1063 = vmatpush1.bf16.msra.mxu0 %v1829_v14 }
  0xfa   :  { %1064 = vmatprep.subr.bf16.mxu0 %v1837_v15 }
  0xfd   :  { %1065 = vmatpush1.bf16.msra.mxu0 %v1835_v16 }
  0xfe   :  { %1066 = vmatprep.subr.bf16.mxu0 %v1843_v17 }
 0x101   :  { %1067 = vmatpush1.bf16.msra.mxu0 %v1841_v18  ;;  %v1572_v18 = vld [vmem:[%s2161_s6] ss:$0 sm:$0xff]  ;;  %s1405_s6 = sshll.u32 %s2015_s4, 4  ;;  %s1406_s6 = int_to_ptr.vmem [resolvable:$true] %s1405_s6 }
 0x102   :  { %1068 = vmatprep.subr.bf16.mxu0 %v1849_v19  ;;  %s1973_s13 = scalar_lea.vmem %s1406_s6, 256  ;;  %p1978_p5 = scmp.lt.s32.totalorder %s1406_s6, %s1406_s6 }
 0x103   :  { %p1974_p4 = scmp.ne.s32.totalorder %s1406_s6, %s1973_s13  ;;  %p1979_p6 = scmp.lt.s32.totalorder %s1973_s13, %s1973_s13 }
 0x105   :  { %1069 = vmatpush1.bf16.msra.mxu0 %v1847_v20  ;;  %p1980_p7 = por %p1979_p6, %p1978_p5 }
 0x106   :  { %1070 = vmatprep.subr.bf16.mxu0 %v1852_v21 }
 0x107   :  { %p1981_p8 = pnand %p1980_p7, %p1974_p4 }
 0x109   :  { %1071 = vmatpush1.bf16.msra.mxu0 %v1850_v22 }
 0x10c   :  { %1073 = vmatmul.mubr.bf16.vlgmr.msra.gmra.mrb[0].mxu0 %v1425_v23 }
 0x168   :  { %v945_v33 = vpop.f32.mrb[0].mxu1 }
 0x169   :  { %v947_v34 = vpop.f32.mrb[1].mxu1  ;;  %v946_v44 = vadd.f32 %v945_v33, %v224_v42 }
 0x16a   :  { %v949_v35 = vpop.f32.mrb[2].mxu1  ;;  %v948_v45 = vadd.f32 %v947_v34, %v228_v43 }
 0x16b   :  { %v951_v36 = vpop.f32.mrb[3].mxu1  ;;  %v950_v49 = vadd.f32 %v949_v35, %v224_v42 }
 0x16c   :  { %v952_v52 = vadd.f32 %v951_v36, %v228_v43 }
 0x1df   :  { %v1074_v46 = vpop.f32.mrb[0].mxu0 }
 0x1e0   :  { %v1633_v50 = vadd.f32 %v1074_v46, %v946_v44  ;;  %v1076_v51 = vpop.f32.mrb[1].mxu0 }
 0x1e1   :  { %v1635_v53 = vadd.f32 %v1076_v51, %v948_v45  ;;  %v1078_v54 = vpop.f32.mrb[2].mxu0 }
 0x1e2   :  { %v1637_v55 = vadd.f32 %v1078_v54, %v950_v49  ;;  %v1080_v56 = vpop.f32.mrb[3].mxu0  ;;  %v1083_v58 = vmax.f32 %v1633_v50, 0.0 }
 0x1e3   :  { %v1639_v57 = vadd.f32 %v1080_v56, %v952_v52  ;;  %v1084_v60 = vmax.f32 %v1635_v53, 0.0 }
 0x1e4   :  { %v1085_v59 = vmax.f32 %v1637_v55, 0.0 }
 0x1e5   :  { %v1086_v61 = vmax.f32 %v1639_v57, 0.0 }
 0x1e6   :  { %v1087_v62 = vpack.c.bf16 %v1085_v59, %v1083_v58 }
 0x1e7   :  { %v1088_v63 = vpack.c.bf16 %v1086_v61, %v1084_v60 }
 0x1e9   :  { %1256 = vmatprep.mubr.bf16.mxu1 %v1088_v63 }
 0x1ea   :  { %1257 = vmatmul.mubr.bf16.vlgmr.msra.gmra.mrb[4].mxu1 %v1087_v62 }
 0x1eb   :  { %1613 = vmatpush3.bf16.msra.mxu1 %v1869_v0  ;;  %1628 = vmatprep.mubr.msk.bf16.mxu1 %vm2014_vm0, %v2013_v32 }
 0x1ec   :  { %1614 = vmatprep.subr.bf16.mxu1 %v2013_v32 }
 0x1ef   :  { %1615 = vmatpush3.bf16.msra.mxu1 %v1870_v47 }
 0x1f0   :  { %1616 = vmatprep.subr.bf16.mxu1 %v2013_v32 }
 0x1f3   :  { %1617 = vmatpush3.bf16.msra.mxu1 %v1871_v48 }
 0x1f4   :  { %1618 = vmatprep.subr.bf16.mxu1 %v2013_v32 }
 0x1f7   :  { %1619 = vmatpush3.bf16.msra.mxu1 %v1872_v1 }
 0x1f8   :  { %1620 = vmatprep.subr.bf16.mxu1 %v2013_v32 }
 0x1fb   :  { %1621 = vmatpush3.bf16.msra.mxu1 %v1873_v2 }
 0x1fc   :  { %1622 = vmatprep.subr.bf16.mxu1 %v2013_v32 }
 0x1ff   :  { %1623 = vmatpush3.bf16.msra.mxu1 %v1874_v3 }
 0x200   :  { %1624 = vmatprep.subr.bf16.mxu1 %v2013_v32 }
 0x203   :  { %1625 = vmatpush3.bf16.msra.mxu1 %v1875_v4 }
 0x204   :  { %1626 = vmatprep.subr.bf16.mxu1 %v2013_v32 }
 0x207   :  { %1627 = vmatpush3.bf16.msra.mxu1 %v1876_v5 }
 0x2bd   :  { %v1597_v6 = vpop.f32.mrb[4].mxu1 }
 0x2be   :  { %v1598_v8 = vpop.f32.mrb[5].mxu1 }
 0x2bf   :  { %v1599_v9 = vadd.f32 %v1598_v8, %v1597_v6  ;;  %v1600_v10 = vpop.f32.mrb[6].mxu1 }
 0x2c0   :  { %v1601_v11 = vpop.f32.mrb[7].mxu1 }
 0x2c1   :  { %v1259_v12 = vadd.f32 %v1599_v9, %v1555_v7  ;;  %v1602_v13 = vadd.f32 %v1601_v11, %v1600_v10 }
 0x2c3   :  { %v1262_v14 = vadd.f32 %v1602_v13, %v1555_v7  ;;  %v1265_v15 = vmax.f32 %v1259_v12, 0.0 }
 0x2c5   :  { %v1266_v16 = vmax.f32 %v1262_v14, 0.0 }
 0x2c7   :  { %v1267_v17 = vpack.c.bf16 %v1266_v16, %v1265_v15 }
 0x2c9   :  { %1629 = vmatmul.mubr.bf16.vlgmr.msra.gmra.mrb[8].mxu1 %v1267_v17 }
 0x39c   :  { %v1373_v19 = vpop.f32.mrb[8].mxu1 }
 0x39d   :  { %v1374_v20 = vadd.f32 %v1572_v18, %v1373_v19  ;;  %v1630_v21 = vpop.f32.mrb[9].mxu1 }
 0x39e   :  { %v1376_v22 = vpop.f32.mrb[10].mxu1 }
 0x39f   :  { %1380 = vmax.xlane.f32.xlu0 %v1374_v20  ;;  %v1631_v23 = vpop.f32.mrb[11].mxu1  ;;  %v1377_v24 = vadd.f32 %v1572_v18, %v1376_v22 }
 0x3a3   :  { %1382 = vmax.xlane.f32.xlu0 %v1377_v24 }
 0x42c   :  { %v1381_v25 = vpop.xlane.xlu0 %1380 }
 0x42d   :  { %v1384_v26 = vsub.f32 %v1374_v20, %v1381_v25 }
 0x42f   :  { %v1386_v27 = vmul.f32 1.442695, %v1384_v26 }
 0x430   :  { %v1383_v28 = vpop.xlane.xlu0 %1382 }
 0x431   :  { %1877 = vpow2.f32 %v1386_v27  ;;  %v1385_v29 = vsub.f32 %v1377_v24, %v1383_v28 }
 0x433   :  { %v1388_v30 = vmul.f32 1.442695, %v1385_v29 }
 0x435   :  { %1879 = vpow2.f32 %v1388_v30 }
 0x43b   :  { %v1878_v31 = vpop.eup %1877 }
 0x43c   :  { %1390 = vadd.xlane.f32.xlu1 %v1878_v31 }
 0x43f   :  { %v1880_v32 = vpop.eup %1879 }
 0x440   :  { %1392 = vadd.xlane.f32.xlu1 %v1880_v32 }
 0x4c9   :  { %v1391_v33 = vpop.xlane.xlu1 %1390 }
 0x4ca   :  { %1881 = vrcp.f32 %v1391_v33 }
 0x4cd   :  { %v1393_v34 = vpop.xlane.xlu1 %1392 }
 0x4ce   :  { %1883 = vrcp.f32 %v1393_v34 }
 0x4d4   :  { %v1882_v35 = vpop.eup %1881 }
 0x4d5   :  { %v1396_v36 = vmul.f32 %v1882_v35, %v1878_v31 }
 0x4d7   :  { %1398 = vst [vmem:[#allocation10] sm:$0xff] %v1396_v36 }
 0x4d8   :  { %v1884_v37 = vpop.eup %1883 }
 0x4d9   :  { %v1397_v38 = vmul.f32 %v1884_v37, %v1880_v32 }
 0x4db   :  { %1399 = vst [vmem:[#allocation10 + $0x8] sm:$0xff] %v1397_v38 }
 0x4dc   :  { %1984 = shalt.err (!%p1981_p8)
}
 0x4dd   :  { %s1985_s17 = scalar_lea.hbm %s2162_s7, 256 }
 0x4de   :  { %p1986_p9 = scmp.ne.s32.totalorder %s2162_s7, %s1985_s17  ;;  %p1989_p10 = scmp.lt.u32.totalorder %s1985_s17, %s2162_s7 }
 0x4e0   :  { %p1991_p11 = pnand %p1989_p10, %p1986_p9 }
 0x4e2   :  { %1994 = shalt.err (!%p1991_p11)
}
 0x4e3   :  { %1411 = dma.vmem_to_hbm [thread:$0]  %s1406_s6, 256, %s2162_s7, [#allocation4], %s2004_s11, %s2004_s11, %s2005_s12  }
 0x4e4   :  { %2001 = dma.done.wait [#allocation4], 256  }
 0x4e5   :  { %2002 = vsyncadd [#allocation4], 4294967040 }
 0x4e6   :  { %1415 = vsyncpa [#allocation3], 1 }
 0x4e7   :  { %1416 = vsyncpa [#allocation6], 1 }
 0x4e8   :  { %1417 = vsyncpa [#allocation9], 1 }
 0x4e9   :  { %1418 = vsyncpa [#allocation4], 1 }

</bundles_post_ra>
